<compile_context>
chip_gen: v5e
topology: v5e:2x2
jax: 0.10.0
libtpu: 0.0.40
codegen_flags: <defaults>
</compile_context>

<pallas_src>
import functools
import math

import jax
import jax.numpy as jnp
from jax.experimental import pallas as pl
from jax.experimental.pallas import tpu as pltpu


def _make_downsample_conv_kernel(m_rows, m_pad, gc, k_dim, kh_sz, kw_sz, wc,
                                 dot_dtype):
    """Builds the fused im2col + matmul kernel (all sizes are static ints)."""

    def kernel(x_ref, w_ref, b_ref, o_ref, xpad_ref, lhs_ref):
        # x_ref    : (m_rows, gc)   pixel-unshuffled rows, row = n*Hc*Wc+hc*Wc+wc
        # w_ref    : (k_dim, F)     mean-folded, flattened conv weight
        # b_ref    : (1, F)         conv bias
        # o_ref    : (m_rows, F)    conv output at ALL (hc, wc) positions
        # xpad_ref : (m_pad, gc)    VMEM scratch, zero-padded copy of x_ref
        # lhs_ref  : (m_rows, k_dim) VMEM scratch, assembled im2col LHS

        # Zero-pad so every shifted-window slice below stays in bounds; the
        # extra rows only ever feed output rows that the wrapper discards.
        xpad_ref[...] = jnp.zeros_like(xpad_ref)
        xpad_ref[pl.ds(0, m_rows), :] = x_ref[...]

        # In-kernel im2col with static slices only (no gather, no reshape):
        #   LHS[m, (kh*KW + kw)*GC + u] = xu_flat[m + kh*Wc + kw, u]
        # which, for every valid output row m=(n,hc,wc), is exactly the
        # (hc+kh, wc+kw) neighbour's pixel-unshuffled channel u.
        for kh in range(kh_sz):
            for kw in range(kw_sz):
                idx = kh * kw_sz + kw
                off = kh * wc + kw
                lhs_ref[:, pl.ds(idx * gc, gc)] = xpad_ref[pl.ds(off, m_rows), :]

        # One lane-dense MXU pass for the whole batch; f32 accumulation.
        acc = jnp.dot(lhs_ref[...].astype(dot_dtype),
                      w_ref[...].astype(dot_dtype),
                      preferred_element_type=jnp.float32)
        o_ref[...] = (acc + b_ref[...]).astype(o_ref.dtype)

    return kernel


def prepare_downsample_conv_params(weight, bias, *, downscale_ratio=2):
    """Folds split/stack/mean into the conv weight and flattens it to a
    lane-dense (K, F) tile.  Call ONCE, outside the jitted per-call path."""
    f_out, c_in, kh_sz, kw_sz = weight.shape
    g = downscale_ratio * downscale_ratio
    # W_exp[f, g*C + k, kh, kw] = W[f, k, kh, kw] / G   (mean over the G groups)
    w_exp = jnp.tile(weight, (1, g, 1, 1)) / float(g)          # (F, G*C, KH, KW)
    # Row index (kh*KW + kw)*G*C + u, matching the in-kernel im2col order.
    w_flat = w_exp.transpose(2, 3, 1, 0).reshape(kh_sz * kw_sz * g * c_in, f_out)
    b_row = bias.reshape(1, f_out)
    return w_flat, b_row


def downsample_conv2d(x, w_flat, b_row, *, kernel_size=3, downscale_ratio=2,
                      channels_last=False, use_bf16=False):
    """Forward pass of DownSampleConv2D.

    x      : (N, C, H, W) float32 NCHW input
    w_flat : (K, F) prepared weight  (from prepare_downsample_conv_params)
    b_row  : (1, F) prepared bias
    returns (N, F, Ho, Wo) NCHW (default) or (N, Ho, Wo, F) if channels_last.
    """
    n, c, h, w = x.shape
    r = downscale_ratio
    hc, wc = h // r, w // r
    g = r * r
    gc = g * c
    kh_sz = kw_sz = kernel_size
    f_out = w_flat.shape[1]
    k_dim = kh_sz * kw_sz * gc
    assert w_flat.shape[0] == k_dim, (w_flat.shape, k_dim)
    ho, wo = hc - kh_sz + 1, wc - kw_sz + 1
    m_rows = n * hc * wc
    max_off = (kh_sz - 1) * wc + (kw_sz - 1)
    m_pad = m_rows + ((max_off + 7) // 8) * 8

    # PixelUnshuffle to channels-last flat rows (the only pre-kernel XLA copy):
    #   xu_flat[n*Hc*Wc + hc*Wc + wc, c*r*r + i*r + j] = x[n, c, hc*r+i, wc*r+j]
    xu_flat = (x.reshape(n, c, hc, r, wc, r)
                 .transpose(0, 2, 4, 1, 3, 5)
                 .reshape(m_rows, gc))

    dot_dtype = jnp.bfloat16 if use_bf16 else jnp.float32
    kernel = _make_downsample_conv_kernel(m_rows, m_pad, gc, k_dim, kh_sz,
                                          kw_sz, wc, dot_dtype)

    out_all = pl.pallas_call(
        kernel,
        out_shape=jax.ShapeDtypeStruct((m_rows, f_out), x.dtype),
        # Single invocation (no grid): whole-array blocks, zero-arg index maps.
        in_specs=[
            pl.BlockSpec((m_rows, gc), lambda: (0, 0)),
            pl.BlockSpec((k_dim, f_out), lambda: (0, 0)),
            pl.BlockSpec((1, f_out), lambda: (0, 0)),
        ],
        out_specs=pl.BlockSpec((m_rows, f_out), lambda: (0, 0)),
        scratch_shapes=[
            pltpu.VMEM((m_pad, gc), x.dtype),      # zero-padded input rows
            pltpu.VMEM((m_rows, k_dim), x.dtype),  # assembled im2col LHS
        ],
        cost_estimate=pl.CostEstimate(
            flops=2 * m_rows * k_dim * f_out,
            transcendentals=0,
            bytes_accessed=4 * (m_rows * gc + k_dim * f_out + f_out
                                + m_rows * f_out)),
    )(xu_flat, w_flat, b_row)

    # Keep only the valid conv positions (hc < Ho, wc < Wo).
    out_nhwc = out_all.reshape(n, hc, wc, f_out)[:, :ho, :wo, :]
    if channels_last:
        return out_nhwc                       # lane-dense (N, Ho, Wo, F)
    # NCHW to match the PyTorch module's output convention.
    return out_nhwc.transpose(0, 3, 1, 2)


def _reference(x, weight, bias, *, downscale_ratio=2):
    """Pure-JAX reference matching the PyTorch forward (mean-then-conv)."""
    n, c, h, w = x.shape
    r = downscale_ratio
    hc, wc = h // r, w // r
    xu = x.reshape(n, c, hc, r, wc, r).transpose(0, 1, 3, 5, 2, 4)
    xu = xu.reshape(n, c * r * r, hc, wc)
    g = r * r
    combined = xu.reshape(n, g, c, hc, wc).mean(axis=1)        # split/stack/mean
    out = jax.lax.conv_general_dilated(
        combined, weight, window_strides=(1, 1), padding="VALID",
        dimension_numbers=("NCHW", "OIHW", "NCHW"),
        precision=jax.lax.Precision.HIGHEST)
    return out + bias.reshape(1, -1, 1, 1)


if __name__ == "__main__":
    batch = 2
    input_channels = 4
    height = width = 16
    n_filters = 128
    kernel_size = 3
    downscale_ratio = 2

    key = jax.random.PRNGKey(0)
    kx, kw_key, kb_key = jax.random.split(key, 3)

    x = jax.random.normal(kx, (batch, input_channels, height, width), jnp.float32)

    # Deterministic Conv2d-style init (kaiming-uniform-like bounds)
    fan_in = input_channels * kernel_size * kernel_size
    bound = 1.0 / math.sqrt(fan_in)
    weight = jax.random.uniform(
        kw_key, (n_filters, input_channels, kernel_size, kernel_size),
        jnp.float32, minval=-bound, maxval=bound)
    bias = jax.random.uniform(kb_key, (n_filters,), jnp.float32,
                              minval=-bound, maxval=bound)

    # Hoisted weight/bias preprocessing: computed once, outside the jitted path.
    w_flat, b_row = prepare_downsample_conv_params(
        weight, bias, downscale_ratio=downscale_ratio)
    w_flat, b_row = jax.block_until_ready((w_flat, b_row))

    ho = height // downscale_ratio - kernel_size + 1
    ref = _reference(x, weight, bias, downscale_ratio=downscale_ratio)

    # 1) Default path: f32 MXU, NCHW output (matches the PyTorch module).
    fwd = jax.jit(functools.partial(
        downsample_conv2d, kernel_size=kernel_size,
        downscale_ratio=downscale_ratio))
    out = jax.block_until_ready(fwd(x, w_flat, b_row))
    assert out.shape == ref.shape == (batch, n_filters, ho, ho), out.shape
    # Tolerance covers MXU f32 rounding + the mean-folded-into-weight
    # summation-order change; structural bugs would be O(0.1), far above it.
    assert jnp.allclose(out, ref, atol=2e-3, rtol=2e-3), (
        float(jnp.max(jnp.abs(out - ref))))

    # 2) Lane-dense NHWC path (no trailing NCHW transpose; preferred layout
    #    for downstream consumers, per the perf review).
    fwd_nhwc = jax.jit(functools.partial(
        downsample_conv2d, kernel_size=kernel_size,
        downscale_ratio=downscale_ratio, channels_last=True))
    out_nhwc = jax.block_until_ready(fwd_nhwc(x, w_flat, b_row))
    assert jnp.allclose(out_nhwc, ref.transpose(0, 2, 3, 1),
                        atol=2e-3, rtol=2e-3)

    # 3) bf16 MXU path (native-rate matmul, f32 accumulation; looser tolerance).
    fwd_bf16 = jax.jit(functools.partial(
        downsample_conv2d, kernel_size=kernel_size,
        downscale_ratio=downscale_ratio, use_bf16=True))
    out_bf16 = jax.block_until_ready(fwd_bf16(x, w_flat, b_row))
    assert jnp.allclose(out_bf16, ref, atol=5e-2, rtol=5e-2)

    print("KERNEL_OK")
</pallas_src>

<mosaic_0001>
module attributes {stable_mosaic.version = 11 : i64} {
  func.func @kernel(%arg0: memref<128x16xf32, #tpu.memory_space<vmem>>, %arg1: memref<144x128xf32, #tpu.memory_space<vmem>>, %arg2: memref<1x128xf32, #tpu.memory_space<vmem>>, %arg3: memref<128x128xf32, #tpu.memory_space<vmem>>, %arg4: memref<152x16xf32, #tpu.memory_space<vmem>>, %arg5: memref<128x144xf32, #tpu.memory_space<vmem>>) attributes {dimension_semantics = [], scalar_prefetch = 0 : i64, scratch_operands = 2 : i64, tpu.core_type = #tpu.core_type<tc>} {
    %cst = arith.constant 0.000000e+00 : f32
    %0 = vector.broadcast %cst : f32 to vector<152x16xf32>
    %c0 = arith.constant 0 : index
    %c0_0 = arith.constant 0 : index
    %1 = vector.load %arg4[%c0, %c0_0] : memref<152x16xf32, #tpu.memory_space<vmem>>, vector<152x16xf32>
    tpu.vector_store %arg4[%c0, %c0_0], %0 {strides = array<i32>} : memref<152x16xf32, #tpu.memory_space<vmem>>, vector<152x16xf32>,
    %c0_1 = arith.constant 0 : index
    %c0_2 = arith.constant 0 : index
    %2 = vector.load %arg0[%c0_1, %c0_2] : memref<128x16xf32, #tpu.memory_space<vmem>>, vector<128x16xf32>
    %c0_3 = arith.constant 0 : index
    %c0_4 = arith.constant 0 : index
    %3 = vector.load %arg4[%c0_3, %c0_4] : memref<152x16xf32, #tpu.memory_space<vmem>>, vector<128x16xf32>
    tpu.vector_store %arg4[%c0_3, %c0_4], %2 {strides = array<i32>} : memref<152x16xf32, #tpu.memory_space<vmem>>, vector<128x16xf32>,
    %c0_5 = arith.constant 0 : index
    %c0_6 = arith.constant 0 : index
    %4 = vector.load %arg4[%c0_5, %c0_6] : memref<152x16xf32, #tpu.memory_space<vmem>>, vector<128x16xf32>
    %c0_7 = arith.constant 0 : index
    %c0_8 = arith.constant 0 : index
    %5 = vector.load %arg5[%c0_7, %c0_8] : memref<128x144xf32, #tpu.memory_space<vmem>>, vector<128x16xf32>
    tpu.vector_store %arg5[%c0_7, %c0_8], %4 {strides = array<i32>} : memref<128x144xf32, #tpu.memory_space<vmem>>, vector<128x16xf32>,
    %c1 = arith.constant 1 : index
    %c0_9 = arith.constant 0 : index
    %6 = vector.load %arg4[%c1, %c0_9] : memref<152x16xf32, #tpu.memory_space<vmem>>, vector<128x16xf32>
    %c0_10 = arith.constant 0 : index
    %c16 = arith.constant 16 : index
    %7 = vector.load %arg5[%c0_10, %c16] : memref<128x144xf32, #tpu.memory_space<vmem>>, vector<128x16xf32>
    tpu.vector_store %arg5[%c0_10, %c16], %6 {strides = array<i32>} : memref<128x144xf32, #tpu.memory_space<vmem>>, vector<128x16xf32>,
    %c2 = arith.constant 2 : index
    %c0_11 = arith.constant 0 : index
    %8 = vector.load %arg4[%c2, %c0_11] : memref<152x16xf32, #tpu.memory_space<vmem>>, vector<128x16xf32>
    %c0_12 = arith.constant 0 : index
    %c32 = arith.constant 32 : index
    %9 = vector.load %arg5[%c0_12, %c32] : memref<128x144xf32, #tpu.memory_space<vmem>>, vector<128x16xf32>
    tpu.vector_store %arg5[%c0_12, %c32], %8 {strides = array<i32>} : memref<128x144xf32, #tpu.memory_space<vmem>>, vector<128x16xf32>,
    %c8 = arith.constant 8 : index
    %c0_13 = arith.constant 0 : index
    %10 = vector.load %arg4[%c8, %c0_13] : memref<152x16xf32, #tpu.memory_space<vmem>>, vector<128x16xf32>
    %c0_14 = arith.constant 0 : index
    %c48 = arith.constant 48 : index
    %11 = vector.load %arg5[%c0_14, %c48] : memref<128x144xf32, #tpu.memory_space<vmem>>, vector<128x16xf32>
    tpu.vector_store %arg5[%c0_14, %c48], %10 {strides = array<i32>} : memref<128x144xf32, #tpu.memory_space<vmem>>, vector<128x16xf32>,
    %c9 = arith.constant 9 : index
    %c0_15 = arith.constant 0 : index
    %12 = vector.load %arg4[%c9, %c0_15] : memref<152x16xf32, #tpu.memory_space<vmem>>, vector<128x16xf32>
    %c0_16 = arith.constant 0 : index
    %c64 = arith.constant 64 : index
    %13 = vector.load %arg5[%c0_16, %c64] : memref<128x144xf32, #tpu.memory_space<vmem>>, vector<128x16xf32>
    tpu.vector_store %arg5[%c0_16, %c64], %12 {strides = array<i32>} : memref<128x144xf32, #tpu.memory_space<vmem>>, vector<128x16xf32>,
    %c10 = arith.constant 10 : index
    %c0_17 = arith.constant 0 : index
    %14 = vector.load %arg4[%c10, %c0_17] : memref<152x16xf32, #tpu.memory_space<vmem>>, vector<128x16xf32>
    %c0_18 = arith.constant 0 : index
    %c80 = arith.constant 80 : index
    %15 = vector.load %arg5[%c0_18, %c80] : memref<128x144xf32, #tpu.memory_space<vmem>>, vector<128x16xf32>
    tpu.vector_store %arg5[%c0_18, %c80], %14 {strides = array<i32>} : memref<128x144xf32, #tpu.memory_space<vmem>>, vector<128x16xf32>,
    %c16_19 = arith.constant 16 : index
    %c0_20 = arith.constant 0 : index
    %16 = vector.load %arg4[%c16_19, %c0_20] : memref<152x16xf32, #tpu.memory_space<vmem>>, vector<128x16xf32>
    %c0_21 = arith.constant 0 : index
    %c96 = arith.constant 96 : index
    %17 = vector.load %arg5[%c0_21, %c96] : memref<128x144xf32, #tpu.memory_space<vmem>>, vector<128x16xf32>
    tpu.vector_store %arg5[%c0_21, %c96], %16 {strides = array<i32>} : memref<128x144xf32, #tpu.memory_space<vmem>>, vector<128x16xf32>,
    %c17 = arith.constant 17 : index
    %c0_22 = arith.constant 0 : index
    %18 = vector.load %arg4[%c17, %c0_22] : memref<152x16xf32, #tpu.memory_space<vmem>>, vector<128x16xf32>
    %c0_23 = arith.constant 0 : index
    %c112 = arith.constant 112 : index
    %19 = vector.load %arg5[%c0_23, %c112] : memref<128x144xf32, #tpu.memory_space<vmem>>, vector<128x16xf32>
    tpu.vector_store %arg5[%c0_23, %c112], %18 {strides = array<i32>} : memref<128x144xf32, #tpu.memory_space<vmem>>, vector<128x16xf32>,
    %c18 = arith.constant 18 : index
    %c0_24 = arith.constant 0 : index
    %20 = vector.load %arg4[%c18, %c0_24] : memref<152x16xf32, #tpu.memory_space<vmem>>, vector<128x16xf32>
    %c0_25 = arith.constant 0 : index
    %c128 = arith.constant 128 : index
    %21 = vector.load %arg5[%c0_25, %c128] : memref<128x144xf32, #tpu.memory_space<vmem>>, vector<128x16xf32>
    tpu.vector_store %arg5[%c0_25, %c128], %20 {strides = array<i32>} : memref<128x144xf32, #tpu.memory_space<vmem>>, vector<128x16xf32>,
    %c0_26 = arith.constant 0 : index
    %c0_27 = arith.constant 0 : index
    %22 = vector.load %arg5[%c0_26, %c0_27] : memref<128x144xf32, #tpu.memory_space<vmem>>, vector<128x144xf32>
    %c0_28 = arith.constant 0 : index
    %c0_29 = arith.constant 0 : index
    %23 = vector.load %arg1[%c0_28, %c0_29] : memref<144x128xf32, #tpu.memory_space<vmem>>, vector<144x128xf32>
    %cst_30 = arith.constant dense<0.000000e+00> : vector<128x128xf32>
    %24 = tpu.matmul %22, %23, %cst_30 {dimension_numbers = #tpu.dot_dimension_numbers<[1], [0], [0], [1], [0, 0, 1, 1], [], []>} : vector<128x144xf32>, vector<144x128xf32>, vector<128x128xf32> -> vector<128x128xf32>
    %c0_31 = arith.constant 0 : index
    %c0_32 = arith.constant 0 : index
    %25 = vector.load %arg2[%c0_31, %c0_32] : memref<1x128xf32, #tpu.memory_space<vmem>>, vector<1x128xf32>
    %26 = vector.broadcast %25 : vector<1x128xf32> to vector<128x128xf32>
    %27 = arith.addf %24, %26 : vector<128x128xf32>
    %c0_33 = arith.constant 0 : index
    %c0_34 = arith.constant 0 : index
    %28 = vector.load %arg3[%c0_33, %c0_34] : memref<128x128xf32, #tpu.memory_space<vmem>>, vector<128x128xf32>
    tpu.vector_store %arg3[%c0_33, %c0_34], %27 {strides = array<i32>} : memref<128x128xf32, #tpu.memory_space<vmem>>, vector<128x128xf32>,
    return
  }
}

</mosaic_0001>

<bundles_post_ra>
// kernel: downsample_conv2d.1
= control target key start
LH: loop header
LB: loop body
LE: loop exit
PB: predicated region body
PF: predicated region fallthrough
CT: control target
= control target key end

     0   :  { %vm14_vm0 = vcmask 130048   ;;  %v1120_v0 = vmov 0.0   ;;  %s1121_s16 = smov 16   ;;  %s1124_s19 = smov 48   ;;  %vm178_vm1 = vcmask 261248   ;;  %vm275_vm2 = vcmask 392448   ;;  %s1859_s0 = inlined_call_operand.vmem [shape: f32[128,16], index: 0, kind: input, shape index: {}]   ;;  %s1860_s1 = inlined_call_operand.vmem [shape: f32[144,128], index: 1, kind: input, shape index: {}]   ;;  %s1861_s2 = inlined_call_operand.vmem [shape: f32[1,128], index: 2, kind: input, shape index: {}]   ;;  %s1862_s3 = inlined_call_operand.vmem [shape: f32[128,128], index: 3, kind: output, shape index: {}]  }
   0x1   :  { %15 = vst.msk [vmem:[#allocation2] sm:$0xff] %vm14_vm0, %v1120_v0  ;;  %v34_v1 = vld [vmem:[%s1859_s0] sm:$0xff]  ;;  %v35_v2 = vld [vmem:[%s1859_s0 + $0x8] sm:$0xff]  ;;  %v36_v4 = vld [vmem:[%s1859_s0 + $0x10] sm:$0xff]  ;;  %s1125_s20 = smov 64   ;;  %s1126_s21 = smov 96  }
   0x2   :  { %16 = vst.msk [vmem:[#allocation2 + $0x8] sm:$0xff] %vm14_vm0, %v1120_v0  ;;  %v37_v5 = vld [vmem:[%s1859_s0 + $0x18] sm:$0xff]  ;;  %v38_v6 = vld [vmem:[%s1859_s0 + $0x20] sm:$0xff]  ;;  %v40_v7 = vld [vmem:[%s1859_s0 + $0x30] sm:$0xff]  ;;  %s1127_s22 = smov 112   ;;  %vm372_vm3 = vcmask 523648  }
   0x3   :  { %50 = vst.msk [vmem:[#allocation2] sm:$0xff] %vm14_vm0, %v34_v1  ;;  %v41_v8 = vld [vmem:[%s1859_s0 + $0x38] sm:$0xff]  ;;  %v42_v9 = vld [vmem:[%s1859_s0 + $0x40] sm:$0xff]  ;;  %v43_v10 = vld [vmem:[%s1859_s0 + $0x48] sm:$0xff]  ;;  %vm469_vm4 = vcmask 654848   ;;  %vm566_vm5 = vcmask 786048  }
   0x4   :  { %51 = vst.msk [vmem:[#allocation2 + $0x8] sm:$0xff] %vm14_vm0, %v35_v2  ;;  %v44_v11 = vld [vmem:[%s1859_s0 + $0x50] sm:$0xff]  ;;  %v39_v12 = vld [vmem:[%s1859_s0 + $0x28] sm:$0xff]  ;;  %v45_v13 = vld [vmem:[%s1859_s0 + $0x58] sm:$0xff]  ;;  %vm663_vm6 = vcmask 917248   ;;  %vm760_vm7 = vcmask 1048448  }
   0x5   :  { %17 = vst.msk [vmem:[#allocation2 + $0x10] sm:$0xff] %vm14_vm0, %v1120_v0  ;;  %v46_v15 = vld [vmem:[%s1859_s0 + $0x60] sm:$0xff]  ;;  %v47_v17 = vld [vmem:[%s1859_s0 + $0x68] sm:$0xff]  ;;  %v48_v18 = vld [vmem:[%s1859_s0 + $0x70] sm:$0xff] }
   0x6   :  { %18 = vst.msk [vmem:[#allocation2 + $0x18] sm:$0xff] %vm14_vm0, %v1120_v0  ;;  %v49_v19 = vld [vmem:[%s1859_s0 + $0x78] sm:$0xff]  ;;  %s1122_s0 = smov 32  }
   0x7   :  { %19 = vst.msk [vmem:[#allocation2 + $0x20] sm:$0xff] %vm14_vm0, %v1120_v0 }
   0x8   :  { %20 = vst.msk [vmem:[#allocation2 + $0x28] sm:$0xff] %vm14_vm0, %v1120_v0 }
   0x9   :  { %21 = vst.msk [vmem:[#allocation2 + $0x30] sm:$0xff] %vm14_vm0, %v1120_v0 }
   0xa   :  { %22 = vst.msk [vmem:[#allocation2 + $0x38] sm:$0xff] %vm14_vm0, %v1120_v0  ;;  %v66_v53 = vld [vmem:[#allocation2] sm:$0xff] }
   0xb   :  { %v98_v3 = vld [vmem:[#allocation2 + $0x1] sm:$0xff]  ;;  %23 = vst.msk [vmem:[#allocation2 + $0x40] sm:$0xff] %vm14_vm0, %v1120_v0 }
   0xc   :  { %130 = vrot.lane.b32.xlu0 %v98_v3, %s1121_s16  ;;  %24 = vst.msk [vmem:[#allocation2 + $0x48] sm:$0xff] %vm14_vm0, %v1120_v0  ;;  %v195_v42 = vld [vmem:[#allocation2 + $0x2] sm:$0xff] }
   0xd   :  { %25 = vst.msk [vmem:[#allocation2 + $0x50] sm:$0xff] %vm14_vm0, %v1120_v0  ;;  %v292_v56 = vld [vmem:[#allocation2 + $0x8] sm:$0xff] }
   0xe   :  { %26 = vst.msk [vmem:[#allocation2 + $0x58] sm:$0xff] %vm14_vm0, %v1120_v0 }
   0xf   :  { %27 = vst.msk [vmem:[#allocation2 + $0x60] sm:$0xff] %vm14_vm0, %v1120_v0 }
  0x10   :  { %28 = vst.msk [vmem:[#allocation2 + $0x68] sm:$0xff] %vm14_vm0, %v1120_v0 }
  0x11   :  { %29 = vst.msk [vmem:[#allocation2 + $0x70] sm:$0xff] %vm14_vm0, %v1120_v0 }
  0x12   :  { %30 = vst.msk [vmem:[#allocation2 + $0x78] sm:$0xff] %vm14_vm0, %v1120_v0 }
  0x13   :  { %31 = vst.msk [vmem:[#allocation2 + $0x80] sm:$0xff] %vm14_vm0, %v1120_v0 }
  0x14   :  { %32 = vst.msk [vmem:[#allocation2 + $0x88] sm:$0xff] %vm14_vm0, %v1120_v0 }
  0x15   :  { %33 = vst.msk [vmem:[#allocation2 + $0x90] sm:$0xff] %vm14_vm0, %v1120_v0 }
  0x16   :  { %52 = vst.msk [vmem:[#allocation2 + $0x10] sm:$0xff] %vm14_vm0, %v36_v4 }
  0x17   :  { %53 = vst.msk [vmem:[#allocation2 + $0x18] sm:$0xff] %vm14_vm0, %v37_v5 }
  0x18   :  { %54 = vst.msk [vmem:[#allocation2 + $0x20] sm:$0xff] %vm14_vm0, %v38_v6 }
  0x19   :  { %56 = vst.msk [vmem:[#allocation2 + $0x30] sm:$0xff] %vm14_vm0, %v40_v7 }
  0x1a   :  { %57 = vst.msk [vmem:[#allocation2 + $0x38] sm:$0xff] %vm14_vm0, %v41_v8  ;;  %v1403_v59 = vld [vmem:[#allocation2 + $0x80] sm:$0xff] }
  0x1b   :  { %58 = vst.msk [vmem:[#allocation2 + $0x40] sm:$0xff] %vm14_vm0, %v42_v9  ;;  %v501_v52 = vld [vmem:[#allocation2 + $0x82] sm:$0xff] }
  0x1c   :  { %59 = vst.msk [vmem:[#allocation2 + $0x48] sm:$0xff] %vm14_vm0, %v43_v10  ;;  %v598_v2 = vld [vmem:[#allocation2 + $0x88] sm:$0xff] }
  0x1d   :  { %v1213_v14 = vld [vmem:[#allocation2 + $0x9] sm:$0xff]  ;;  %60 = vst.msk [vmem:[#allocation2 + $0x50] sm:$0xff] %vm14_vm0, %v44_v11  ;;  %v1432_v3 = vld [vmem:[#allocation2 + $0x81] sm:$0xff] }
  0x1e   :  { %v1219_v16 = vld [vmem:[#allocation2 + $0x11] sm:$0xff]  ;;  %132 = vrot.lane.b32.xlu0 %v1213_v14, %s1121_s16  ;;  %55 = vst.msk [vmem:[#allocation2 + $0x28] sm:$0xff] %vm14_vm0, %v39_v12 }
  0x1f   :  { %134 = vrot.lane.b32.xlu1 %v1219_v16, %s1121_s16  ;;  %61 = vst.msk [vmem:[#allocation2 + $0x58] sm:$0xff] %vm14_vm0, %v45_v13  ;;  %v1242_v21 = vld [vmem:[#allocation2 + $0x19] sm:$0xff]  ;;  %v1334_v46 = vld [vmem:[#allocation2 + $0xa] sm:$0xff] }
  0x20   :  { %62 = vst.msk [vmem:[#allocation2 + $0x60] sm:$0xff] %vm14_vm0, %v46_v15  ;;  %v1252_v23 = vld [vmem:[#allocation2 + $0x12] sm:$0xff]  ;;  %v1254_v24 = vld [vmem:[#allocation2 + $0x1a] sm:$0xff] }
  0x21   :  { %63 = vst.msk [vmem:[#allocation2 + $0x68] sm:$0xff] %vm14_vm0, %v47_v17  ;;  %v1239_v20 = vld [vmem:[#allocation2 + $0x31] sm:$0xff]  ;;  %v1382_v54 = vld [vmem:[#allocation2 + $0x20] sm:$0xff] }
  0x22   :  { %64 = vst.msk [vmem:[#allocation2 + $0x70] sm:$0xff] %vm14_vm0, %v48_v18  ;;  %v105_v27 = vld [vmem:[#allocation2 + $0x39] sm:$0xff]  ;;  %v1386_v55 = vld [vmem:[#allocation2 + $0x10] sm:$0xff] }
  0x23   :  { %65 = vst.msk [vmem:[#allocation2 + $0x78] sm:$0xff] %vm14_vm0, %v49_v19  ;;  %v1271_v29 = vld [vmem:[#allocation2 + $0x32] sm:$0xff]  ;;  %v1279_v31 = vld [vmem:[#allocation2 + $0x41] sm:$0xff] }
  0x24   :  { %793 = vst.msk [vmem:[#allocation3 + $0x8] sm:$0xff] %vm14_vm0, %v1252_v23  ;;  %v1260_v25 = vld [vmem:[#allocation2 + $0x49] sm:$0xff]  ;;  %v299_v43 = vld [vmem:[#allocation2 + $0x40] sm:$0xff]  ;;  %v1397_v58 = vld [vmem:[#allocation2 + $0x18] sm:$0xff] }
  0x25   :  { %v1244_v22 = vld [vmem:[#allocation2 + $0x21] sm:$0xff]  ;;  %794 = vst.msk [vmem:[#allocation3 + $0x18] sm:$0xff] %vm14_vm0, %v1254_v24  ;;  %v1262_v26 = vld [vmem:[#allocation2 + $0x29] sm:$0xff]  ;;  %v1414_v62 = vld [vmem:[#allocation2 + $0x38] sm:$0xff] }
  0x26   :  { %142 = vrot.lane.b32.xlu0 %v1239_v20, %s1121_s16  ;;  %138 = vrot.lane.b32.xlu2 %v1244_v22, %s1121_s16  ;;  %v1269_v28 = vld [vmem:[#allocation2 + $0x2a] sm:$0xff]  ;;  %797 = vst.msk [vmem:[#allocation3 + $0x48] sm:$0xff] %vm14_vm0, %v1271_v29  ;;  %v203_v33 = vld [vmem:[#allocation2 + $0x42] sm:$0xff]  ;;  %v1325_v44 = vld [vmem:[#allocation2 + $0x3a] sm:$0xff] }
  0x27   :  { %136 = vrot.lane.b32.xlu1 %v1242_v21, %s1121_s16  ;;  %796 = vst.msk [vmem:[#allocation3 + $0x38] sm:$0xff] %vm14_vm0, %v1269_v28  ;;  %v1281_v32 = vld [vmem:[#allocation2 + $0x51] sm:$0xff]  ;;  %v1296_v36 = vld [vmem:[#allocation2 + $0x59] sm:$0xff]  ;;  %v1306_v38 = vld [vmem:[#allocation2 + $0x22] sm:$0xff] }
  0x28   :  { %v1277_v30 = vld [vmem:[#allocation2 + $0x61] sm:$0xff]  ;;  %v1289_v34 = vld [vmem:[#allocation2 + $0x4a] sm:$0xff]  ;;  %799 = vst.msk [vmem:[#allocation3 + $0x68] sm:$0xff] %vm14_vm0, %v203_v33  ;;  %v1342_v48 = vld [vmem:[#allocation2 + $0x52] sm:$0xff] }
  0x29   :  { %800 = vst.msk [vmem:[#allocation3 + $0x78] sm:$0xff] %vm14_vm0, %v1289_v34  ;;  %v1298_v37 = vld [vmem:[#allocation2 + $0x69] sm:$0xff]  ;;  %v1312_v40 = vld [vmem:[#allocation2 + $0x5a] sm:$0xff] }
  0x2a   :  { %v1294_v35 = vld [vmem:[#allocation2 + $0x79] sm:$0xff]  ;;  %v1308_v39 = vld [vmem:[#allocation2 + $0x62] sm:$0xff]  ;;  %795 = vst.msk [vmem:[#allocation3 + $0x28] sm:$0xff] %vm14_vm0, %v1306_v38  ;;  %v1318_v41 = vld [vmem:[#allocation2 + $0x71] sm:$0xff] }
  0x2b   :  { %803 = vst.msk [vmem:[#allocation3 + $0xa8] sm:$0xff] %vm14_vm0, %v1308_v39  ;;  %v1328_v45 = vld [vmem:[#allocation2 + $0x72] sm:$0xff]  ;;  %v590_v47 = vld [vmem:[#allocation2 + $0x48] sm:$0xff]  ;;  %v1354_v50 = vld [vmem:[#allocation2 + $0x7a] sm:$0xff] }
  0x2c   :  { %802 = vst.msk [vmem:[#allocation3 + $0x98] sm:$0xff] %vm14_vm0, %v1312_v40  ;;  %v1352_v49 = vld [vmem:[#allocation2 + $0x6a] sm:$0xff]  ;;  %v1427_v0 = vld [vmem:[#allocation2 + $0x58] sm:$0xff]  ;;  %v1437_v4 = vld [vmem:[#allocation2 + $0x60] sm:$0xff] }
  0x2d   :  { %90 = vst.msk [vmem:[#allocation3 + $0x80] sm:$0xff] %vm14_vm0, %v299_v43  ;;  %v1372_v51 = vld [vmem:[#allocation2 + $0x50] sm:$0xff]  ;;  %v1395_v57 = vld [vmem:[#allocation2 + $0x28] sm:$0xff]  ;;  %v1457_v10 = vld [vmem:[#allocation2 + $0x78] sm:$0xff] }
  0x2e   :  { %148 = vrot.lane.b32.xlu0 %v1260_v25, %s1121_s16  ;;  %140 = vrot.lane.b32.xlu2 %v1262_v26, %s1121_s16  ;;  %798 = vst.msk [vmem:[#allocation3 + $0x58] sm:$0xff] %vm14_vm0, %v1325_v44  ;;  %v1409_v61 = vld [vmem:[#allocation2 + $0x30] sm:$0xff]  ;;  %v1447_v9 = vld [vmem:[#allocation2 + $0x68] sm:$0xff] }
  0x2f   :  { %144 = vrot.lane.b32.xlu1 %v105_v27, %s1121_s16  ;;  %805 = vst.msk [vmem:[#allocation3 + $0xc8] sm:$0xff] %vm14_vm0, %v1328_v45  ;;  %v1442_v5 = vld [vmem:[#allocation2 + $0x70] sm:$0xff]  ;;  %v1475_v19 = vld [vmem:[%s1860_s1 + $0x88] sm:$0xff]  ;;  %v810_v27 = vld [vmem:[#allocation3 + $0x8] sm:$0xff] }
  0x30   :  { %91 = vst.msk [vmem:[#allocation3 + $0x90] sm:$0xff] %vm14_vm0, %v590_v47  ;;  %990 = vmatpush.msra.mxu1 %v1475_v19 }
  0x31   :  { %801 = vst.msk [vmem:[#allocation3 + $0x88] sm:$0xff] %vm14_vm0, %v1342_v48 }
  0x32   :  { %804 = vst.msk [vmem:[#allocation3 + $0xb8] sm:$0xff] %vm14_vm0, %v1352_v49 }
  0x33   :  { %806 = vst.msk [vmem:[#allocation3 + $0xd8] sm:$0xff] %vm14_vm0, %v1354_v50 }
  0x34   :  { %92 = vst.msk [vmem:[#allocation3 + $0xa0] sm:$0xff] %vm14_vm0, %v1372_v51 }
  0x35   :  { %807 = vst.msk [vmem:[#allocation3 + $0xe8] sm:$0xff] %vm14_vm0, %v501_v52 }
  0x36   :  { %154 = vrot.lane.b32.xlu0 %v1277_v30, %s1121_s16  ;;  %146 = vrot.lane.b32.xlu2 %v1279_v31, %s1121_s16  ;;  %82 = vst.msk [vmem:[#allocation3] sm:$0xff] %vm14_vm0, %v66_v53 }
  0x37   :  { %150 = vrot.lane.b32.xlu1 %v1281_v32, %s1121_s16  ;;  %86 = vst.msk [vmem:[#allocation3 + $0x40] sm:$0xff] %vm14_vm0, %v1382_v54 }
  0x38   :  { %84 = vst.msk [vmem:[#allocation3 + $0x20] sm:$0xff] %vm14_vm0, %v1386_v55 }
  0x39   :  { %83 = vst.msk [vmem:[#allocation3 + $0x10] sm:$0xff] %vm14_vm0, %v292_v56 }
  0x3a   :  { %87 = vst.msk [vmem:[#allocation3 + $0x50] sm:$0xff] %vm14_vm0, %v1395_v57 }
  0x3b   :  { %85 = vst.msk [vmem:[#allocation3 + $0x30] sm:$0xff] %vm14_vm0, %v1397_v58 }
  0x3c   :  { %88 = vst.msk [vmem:[#allocation3 + $0x60] sm:$0xff] %vm14_vm0, %v1409_v61 }
  0x3d   :  { %89 = vst.msk [vmem:[#allocation3 + $0x70] sm:$0xff] %vm14_vm0, %v1414_v62 }
  0x3e   :  { %160 = vrot.lane.b32.xlu0 %v1294_v35, %s1121_s16  ;;  %152 = vrot.lane.b32.xlu2 %v1296_v36, %s1121_s16  ;;  %93 = vst.msk [vmem:[#allocation3 + $0xb0] sm:$0xff] %vm14_vm0, %v1427_v0 }
  0x3f   :  { %156 = vrot.lane.b32.xlu1 %v1298_v37, %s1121_s16  ;;  %94 = vst.msk [vmem:[#allocation3 + $0xc0] sm:$0xff] %vm14_vm0, %v1437_v4 }
  0x40   :  { %96 = vst.msk [vmem:[#allocation3 + $0xe0] sm:$0xff] %vm14_vm0, %v1442_v5 }
  0x41   :  { %95 = vst.msk [vmem:[#allocation3 + $0xd0] sm:$0xff] %vm14_vm0, %v1447_v9 }
  0x42   :  { %97 = vst.msk [vmem:[#allocation3 + $0xf0] sm:$0xff] %vm14_vm0, %v1457_v10 }
  0x46   :  { %231 = vrot.lane.b32.xlu0 %v1252_v23, %s1122_s0  ;;  %158 = vrot.lane.b32.xlu2 %v1318_v41, %s1121_s16  ;;  %s1123_s16 = smov 80  }
  0x47   :  { %227 = vrot.lane.b32.xlu1 %v195_v42, %s1122_s0 }
  0x4e   :  { %237 = vrot.lane.b32.xlu0 %v1269_v28, %s1122_s0  ;;  %229 = vrot.lane.b32.xlu2 %v1334_v46, %s1122_s0 }
  0x4f   :  { %233 = vrot.lane.b32.xlu1 %v1254_v24, %s1122_s0 }
  0x56   :  { %243 = vrot.lane.b32.xlu0 %v203_v33, %s1122_s0  ;;  %235 = vrot.lane.b32.xlu2 %v1306_v38, %s1122_s0 }
  0x57   :  { %239 = vrot.lane.b32.xlu1 %v1271_v29, %s1122_s0 }
  0x5e   :  { %249 = vrot.lane.b32.xlu0 %v1312_v40, %s1122_s0  ;;  %241 = vrot.lane.b32.xlu2 %v1325_v44, %s1122_s0 }
  0x5f   :  { %245 = vrot.lane.b32.xlu1 %v1289_v34, %s1122_s0 }
  0x66   :  { %255 = vrot.lane.b32.xlu0 %v1328_v45, %s1122_s0  ;;  %247 = vrot.lane.b32.xlu2 %v1342_v48, %s1122_s0 }
  0x67   :  { %251 = vrot.lane.b32.xlu1 %v1308_v39, %s1122_s0 }
  0x6e   :  { %532 = vrot.lane.b32.xlu0 %v203_v33, %s1123_s16  ;;  %253 = vrot.lane.b32.xlu2 %v1352_v49, %s1122_s0 }
  0x6f   :  { %338 = vrot.lane.b32.xlu1 %v299_v43, %s1124_s19 }
  0x76   :  { %340 = vrot.lane.b32.xlu0 %v590_v47, %s1124_s19  ;;  %435 = vrot.lane.b32.xlu2 %v1279_v31, %s1125_s20 }
  0x77   :  { %629 = vrot.lane.b32.xlu1 %v590_v47, %s1126_s21  ;;  %v814_v47 = vld [vmem:[#allocation3 + $0x28] sm:$0xff] }
  0x7e   :  { %354 = vrot.lane.b32.xlu0 %v1403_v59, %s1124_s19  ;;  %726 = vrot.lane.b32.xlu2 %v1260_v25, %s1127_s22  ;;  %v131_v60 = vpop.permute.xlu0 %130 }
  0x7f   :  { %257 = vrot.lane.b32.xlu1 %v1354_v50, %s1122_s0  ;;  %179 = vst.msk [vmem:[#allocation3] sm:$0xff] %vm178_vm1, %v131_v60  ;;  %v852_v60 = vld [vmem:[%s1860_s1 + $0x58] sm:$0xff] }
  0x80   :  { %v139_v63 = vpop.permute.xlu2 %138 }
  0x81   :  { %183 = vst.msk [vmem:[#allocation3 + $0x40] sm:$0xff] %vm178_vm1, %v139_v63 }
  0x86   :  { %631 = vrot.lane.b32.xlu0 %v1372_v51, %s1126_s21  ;;  %437 = vrot.lane.b32.xlu2 %v1260_v25, %s1125_s20  ;;  %v1480_v25 = vld [vmem:[%s1860_s1 + $0x80] sm:$0xff] }
  0x87   :  { %534 = vrot.lane.b32.xlu1 %v1289_v34, %s1123_s16  ;;  %991 = vmatpush.msra.mxu1 %v1480_v25  ;;  %v812_v34 = vld [vmem:[#allocation3 + $0x18] sm:$0xff] }
  0x88   :  { %v141_v1 = vpop.permute.xlu2 %140  ;;  %1061 = vmatmul.msk.f32.vlgmr.msra.gmra.mxu1 %vm14_vm0, %v810_v27 }
  0x89   :  { %184 = vst.msk [vmem:[#allocation3 + $0x50] sm:$0xff] %vm178_vm1, %v141_v1 }
  0x8e   :  { %645 = vrot.lane.b32.xlu0 %v598_v2, %s1126_s21  ;;  %451 = vrot.lane.b32.xlu2 %v1432_v3, %s1125_s20 }
  0x8f   :  { %548 = vrot.lane.b32.xlu1 %v501_v52, %s1123_s16 }
  0x90   :  { %v133_v6 = vpop.permute.xlu0 %132  ;;  %v147_v7 = vpop.permute.xlu2 %146  ;;  %1062 = vmatmul.msk.f32.gmra.mxu1 %vm14_vm0, %v812_v34  ;;  %v822_v34 = vld [vmem:[#allocation3 + $0x68] sm:$0xff] }
  0x91   :  { %v135_v8 = vpop.permute.xlu1 %134  ;;  %180 = vst.msk [vmem:[#allocation3 + $0x10] sm:$0xff] %vm178_vm1, %v133_v6  ;;  %v818_v6 = vld [vmem:[#allocation3 + $0x48] sm:$0xff] }
  0x92   :  { %181 = vst.msk [vmem:[#allocation3 + $0x20] sm:$0xff] %vm178_vm1, %v135_v8 }
  0x93   :  { %187 = vst.msk [vmem:[#allocation3 + $0x80] sm:$0xff] %vm178_vm1, %v147_v7  ;;  %v848_v7 = vld [vmem:[%s1860_s1 + $0x38] sm:$0xff] }
  0x96   :  { %421 = vrot.lane.b32.xlu0 %v1213_v14, %s1125_s20  ;;  %728 = vrot.lane.b32.xlu2 %v1281_v32, %s1127_s22  ;;  %v695_v14 = vld [vmem:[#allocation2 + $0x89] sm:$0xff] }
  0x97   :  { %324 = vrot.lane.b32.xlu1 %v292_v56, %s1124_s19  ;;  %v816_v56 = vld [vmem:[#allocation3 + $0x38] sm:$0xff] }
  0x98   :  { %v143_v11 = vpop.permute.xlu0 %142  ;;  %v153_v12 = vpop.permute.xlu2 %152  ;;  %1063 = vmatmul.msk.f32.gmra.mxu1 %vm14_vm0, %v814_v47  ;;  %v824_v47 = vld [vmem:[#allocation3 + $0x78] sm:$0xff] }
  0x99   :  { %v137_v13 = vpop.permute.xlu1 %136  ;;  %185 = vst.msk [vmem:[#allocation3 + $0x60] sm:$0xff] %vm178_vm1, %v143_v11 }
  0x9a   :  { %182 = vst.msk [vmem:[#allocation3 + $0x30] sm:$0xff] %vm178_vm1, %v137_v13  ;;  %v847_v13 = vld [vmem:[%s1860_s1 + $0x30] sm:$0xff] }
  0x9b   :  { %190 = vst.msk [vmem:[#allocation3 + $0xb0] sm:$0xff] %vm178_vm1, %v153_v12 }
  0x9e   :  { %439 = vrot.lane.b32.xlu0 %v1281_v32, %s1125_s20  ;;  %742 = vrot.lane.b32.xlu2 %v695_v14, %s1127_s22  ;;  %v846_v14 = vld [vmem:[%s1860_s1 + $0x28] sm:$0xff] }
  0x9f   :  { %342 = vrot.lane.b32.xlu1 %v1372_v51, %s1124_s19 }
  0xa0   :  { %v149_v15 = vpop.permute.xlu0 %148  ;;  %v159_v17 = vpop.permute.xlu2 %158  ;;  %1064 = vmatmul.msk.f32.gmra.mxu1 %vm14_vm0, %v816_v56 }
  0xa1   :  { %v145_v18 = vpop.permute.xlu1 %144  ;;  %188 = vst.msk [vmem:[#allocation3 + $0x90] sm:$0xff] %vm178_vm1, %v149_v15  ;;  %v845_v15 = vld [vmem:[%s1860_s1 + $0x20] sm:$0xff] }
  0xa2   :  { %186 = vst.msk [vmem:[#allocation3 + $0x70] sm:$0xff] %vm178_vm1, %v145_v18  ;;  %v844_v18 = vld [vmem:[%s1860_s1 + $0x18] sm:$0xff] }
  0xa3   :  { %193 = vst.msk [vmem:[#allocation3 + $0xe0] sm:$0xff] %vm178_vm1, %v159_v17  ;;  %v820_v17 = vld [vmem:[#allocation3 + $0x58] sm:$0xff] }
  0xa6   :  { %712 = vrot.lane.b32.xlu0 %v1219_v16, %s1127_s22  ;;  %518 = vrot.lane.b32.xlu2 %v1334_v46, %s1123_s16 }
  0xa7   :  { %615 = vrot.lane.b32.xlu1 %v1386_v55, %s1126_s21 }
  0xa8   :  { %v155_v31 = vpop.permute.xlu0 %154  ;;  %v230_v32 = vpop.permute.xlu2 %229  ;;  %1065 = vmatmul.msk.f32.gmra.mxu1 %vm14_vm0, %v818_v6 }
  0xa9   :  { %v151_v33 = vpop.permute.xlu1 %150  ;;  %191 = vst.msk [vmem:[#allocation3 + $0xc0] sm:$0xff] %vm178_vm1, %v155_v31 }
  0xaa   :  { %189 = vst.msk [vmem:[#allocation3 + $0xa0] sm:$0xff] %vm178_vm1, %v151_v33  ;;  %v841_v33 = vld [vmem:[%s1860_s1] sm:$0xff] }
  0xab   :  { %277 = vst.msk [vmem:[#allocation3 + $0x10] sm:$0xff] %vm275_vm2, %v230_v32 }
  0xae   :  { %326 = vrot.lane.b32.xlu0 %v1386_v55, %s1124_s19  ;;  %536 = vrot.lane.b32.xlu2 %v1342_v48, %s1123_s16  ;;  %v856_v48 = vld [vmem:[%s1860_s1 + $0x78] sm:$0xff]  ;;  %v853_v55 = vld [vmem:[%s1860_s1 + $0x60] sm:$0xff] }
  0xaf   :  { %633 = vrot.lane.b32.xlu1 %v1427_v0, %s1126_s21  ;;  %1077 = vmatpush.msra.mxu2 %v856_v48 }
  0xb0   :  { %v161_v42 = vpop.permute.xlu0 %160  ;;  %v236_v43 = vpop.permute.xlu2 %235  ;;  %1078 = vmatpush.msra.mxu3 %v856_v48  ;;  %911 = vmatpush.msra.mxu0 %v856_v48 }
  0xb1   :  { %v157_v46 = vpop.permute.xlu1 %156  ;;  %194 = vst.msk [vmem:[#allocation3 + $0xf0] sm:$0xff] %vm178_vm1, %v161_v42  ;;  %1066 = vmatmul.msk.f32.gmra.mxu1 %vm14_vm0, %v820_v17 }
  0xb2   :  { %192 = vst.msk [vmem:[#allocation3 + $0xd0] sm:$0xff] %vm178_vm1, %v157_v46 }
  0xb3   :  { %280 = vst.msk [vmem:[#allocation3 + $0x40] sm:$0xff] %vm275_vm2, %v236_v43 }
  0xb6   :  { %520 = vrot.lane.b32.xlu0 %v1252_v23, %s1123_s16  ;;  %730 = vrot.lane.b32.xlu2 %v1296_v36, %s1127_s22  ;;  %v855_v23 = vld [vmem:[%s1860_s1 + $0x70] sm:$0xff] }
  0xb7   :  { %423 = vrot.lane.b32.xlu1 %v1219_v16, %s1125_s20  ;;  %1079 = vmatpush.msra.mxu2 %v855_v23  ;;  %v854_v16 = vld [vmem:[%s1860_s1 + $0x68] sm:$0xff] }
  0xb8   :  { %v232_v51 = vpop.permute.xlu0 %231  ;;  %v242_v52 = vpop.permute.xlu2 %241  ;;  %1080 = vmatpush.msra.mxu3 %v855_v23  ;;  %912 = vmatpush.msra.mxu0 %v855_v23 }
  0xb9   :  { %v228_v53 = vpop.permute.xlu1 %227  ;;  %278 = vst.msk [vmem:[#allocation3 + $0x20] sm:$0xff] %vm275_vm2, %v232_v51  ;;  %1081 = vmatpush.msra.mxu2 %v854_v16  ;;  %1067 = vmatmul.msk.f32.gmra.mxu1 %vm14_vm0, %v822_v34 }
  0xba   :  { %276 = vst.msk [vmem:[#allocation3] sm:$0xff] %vm275_vm2, %v228_v53  ;;  %1082 = vmatpush.msra.mxu3 %v854_v16  ;;  %913 = vmatpush.msra.mxu0 %v854_v16  ;;  %v826_v53 = vld [vmem:[#allocation3 + $0x88] sm:$0xff] }
  0xbb   :  { %283 = vst.msk [vmem:[#allocation3 + $0x70] sm:$0xff] %vm275_vm2, %v242_v52  ;;  %1083 = vmatpush.msra.mxu2 %v853_v55 }
  0xbc   :  { %1084 = vmatpush.msra.mxu3 %v853_v55  ;;  %914 = vmatpush.msra.mxu0 %v853_v55 }
  0xbd   :  { %1085 = vmatpush.msra.mxu2 %v852_v60 }
  0xbe   :  { %538 = vrot.lane.b32.xlu0 %v1312_v40, %s1123_s16  ;;  %344 = vrot.lane.b32.xlu2 %v1427_v0, %s1124_s19  ;;  %v851_v40 = vld [vmem:[%s1860_s1 + $0x50] sm:$0xff]  ;;  %v849_v0 = vld [vmem:[%s1860_s1 + $0x40] sm:$0xff] }
  0xbf   :  { %441 = vrot.lane.b32.xlu1 %v1296_v36, %s1125_s20  ;;  %v850_v36 = vld [vmem:[%s1860_s1 + $0x48] sm:$0xff]  ;;  %1086 = vmatpush.msra.mxu3 %v852_v60 }
  0xc0   :  { %v238_v63 = vpop.permute.xlu0 %237  ;;  %v248_v1 = vpop.permute.xlu2 %247  ;;  %1087 = vmatpush.msra.mxu2 %v851_v40  ;;  %915 = vmatpush.msra.mxu0 %v852_v60 }
  0xc1   :  { %v234_v2 = vpop.permute.xlu1 %233  ;;  %281 = vst.msk [vmem:[#allocation3 + $0x50] sm:$0xff] %vm275_vm2, %v238_v63  ;;  %1088 = vmatpush.msra.mxu3 %v851_v40  ;;  %1068 = vmatmul.msk.f32.gmra.mxu1 %vm14_vm0, %v824_v47  ;;  %v589_v47 = vld [vmem:[#allocation2 + $0x40] sm:$0xff] }
  0xc2   :  { %279 = vst.msk [vmem:[#allocation3 + $0x30] sm:$0xff] %vm275_vm2, %v234_v2  ;;  %1089 = vmatpush.msra.mxu2 %v850_v36  ;;  %916 = vmatpush.msra.mxu0 %v851_v40  ;;  %v828_v2 = vld [vmem:[#allocation3 + $0x98] sm:$0xff] }
  0xc3   :  { %286 = vst.msk [vmem:[#allocation3 + $0xa0] sm:$0xff] %vm275_vm2, %v248_v1  ;;  %1090 = vmatpush.msra.mxu3 %v850_v36  ;;  %v830_v1 = vld [vmem:[#allocation3 + $0xa8] sm:$0xff]  ;;  %v832_v40 = vld [vmem:[#allocation3 + $0xb8] sm:$0xff] }
  0xc4   :  { %1091 = vmatpush.msra.mxu2 %v849_v0  ;;  %917 = vmatpush.msra.mxu0 %v850_v36  ;;  %v792_v36 = vld [vmem:[#allocation2 + $0x8a] sm:$0xff] }
  0xc5   :  { %1092 = vmatpush.msra.mxu3 %v849_v0  ;;  %808 = vst.msk [vmem:[#allocation3 + $0xf8] sm:$0xff] %vm14_vm0, %v792_v36 }
  0xc6   :  { %732 = vrot.lane.b32.xlu0 %v1277_v30, %s1127_s22  ;;  %617 = vrot.lane.b32.xlu2 %v1397_v58, %s1126_s21 }
  0xc7   :  { %714 = vrot.lane.b32.xlu1 %v1242_v21, %s1127_s22  ;;  %1093 = vmatpush.msra.mxu2 %v848_v7 }
  0xc8   :  { %v244_v8 = vpop.permute.xlu0 %243  ;;  %v254_v11 = vpop.permute.xlu2 %253  ;;  %918 = vmatpush.msra.mxu0 %v849_v0  ;;  %1094 = vmatpush.msra.mxu3 %v848_v7 }
  0xc9   :  { %v240_v12 = vpop.permute.xlu1 %239  ;;  %284 = vst.msk [vmem:[#allocation3 + $0x80] sm:$0xff] %vm275_vm2, %v244_v8  ;;  %1095 = vmatpush.msra.mxu2 %v847_v13  ;;  %1069 = vmatmul.msk.f32.gmra.mxu1 %vm14_vm0, %v826_v53 }
  0xca   :  { %282 = vst.msk [vmem:[#allocation3 + $0x60] sm:$0xff] %vm275_vm2, %v240_v12  ;;  %919 = vmatpush.msra.mxu0 %v848_v7  ;;  %1096 = vmatpush.msra.mxu3 %v847_v13  ;;  %v834_v7 = vld [vmem:[#allocation3 + $0xc8] sm:$0xff] }
  0xcb   :  { %289 = vst.msk [vmem:[#allocation3 + $0xd0] sm:$0xff] %vm275_vm2, %v254_v11  ;;  %1097 = vmatpush.msra.mxu2 %v846_v14  ;;  %v394_v11 = vld [vmem:[#allocation2 + $0x31] sm:$0xff] }
  0xcc   :  { %920 = vmatpush.msra.mxu0 %v847_v13  ;;  %1098 = vmatpush.msra.mxu3 %v846_v14  ;;  %v836_v13 = vld [vmem:[#allocation3 + $0xd8] sm:$0xff] }
  0xcd   :  { %1099 = vmatpush.msra.mxu2 %v845_v15 }
  0xce   :  { %346 = vrot.lane.b32.xlu0 %v1437_v4, %s1124_s19  ;;  %635 = vrot.lane.b32.xlu2 %v1437_v4, %s1126_s21  ;;  %v843_v4 = vld [vmem:[%s1860_s1 + $0x10] sm:$0xff] }
  0xcf   :  { %328 = vrot.lane.b32.xlu1 %v1397_v58, %s1124_s19  ;;  %1101 = vmatpush.msra.mxu2 %v844_v18  ;;  %v842_v58 = vld [vmem:[%s1860_s1 + $0x8] sm:$0xff] }
  0xd0   :  { %v250_v27 = vpop.permute.xlu0 %249  ;;  %v436_v31 = vpop.permute.xlu2 %435  ;;  %921 = vmatpush.msra.mxu0 %v846_v14  ;;  %1100 = vmatpush.msra.mxu3 %v845_v15 }
  0xd1   :  { %v246_v32 = vpop.permute.xlu1 %245  ;;  %287 = vst.msk [vmem:[#allocation3 + $0xb0] sm:$0xff] %vm275_vm2, %v250_v27  ;;  %1103 = vmatpush.msra.mxu2 %v843_v4  ;;  %1070 = vmatmul.msk.f32.gmra.mxu1 %vm14_vm0, %v828_v2  ;;  %v838_v27 = vld [vmem:[#allocation3 + $0xe8] sm:$0xff] }
  0xd2   :  { %285 = vst.msk [vmem:[#allocation3 + $0x90] sm:$0xff] %vm275_vm2, %v246_v32  ;;  %922 = vmatpush.msra.mxu0 %v845_v15  ;;  %1102 = vmatpush.msra.mxu3 %v844_v18  ;;  %v840_v32 = vld [vmem:[#allocation3 + $0xf8] sm:$0xff] }
  0xd3   :  { %1105 = vmatpush.msra.mxu2 %v842_v58 }
  0xd4   :  { %923 = vmatpush.msra.mxu0 %v844_v18  ;;  %1104 = vmatpush.msra.mxu3 %v843_v4 }
  0xd5   :  { %1107 = vmatpush.msra.mxu2 %v841_v33 }
  0xd6   :  { %619 = vrot.lane.b32.xlu0 %v1382_v54, %s1126_s21  ;;  %425 = vrot.lane.b32.xlu2 %v1242_v21, %s1125_s20 }
  0xd7   :  { %522 = vrot.lane.b32.xlu1 %v1254_v24, %s1123_s16  ;;  %924 = vmatpush.msra.mxu0 %v843_v4 }
  0xd8   :  { %v256_v42 = vpop.permute.xlu0 %255  ;;  %v727_v43 = vpop.permute.xlu2 %726  ;;  %1106 = vmatpush.msra.mxu3 %v842_v58 }
  0xd9   :  { %v252_v46 = vpop.permute.xlu1 %251  ;;  %290 = vst.msk [vmem:[#allocation3 + $0xe0] sm:$0xff] %vm275_vm2, %v256_v42  ;;  %925 = vmatpush.msra.mxu0 %v842_v58  ;;  %v686_v58 = vld [vmem:[#allocation2 + $0x41] sm:$0xff] }
  0xda   :  { %288 = vst.msk [vmem:[#allocation3 + $0xc0] sm:$0xff] %vm275_vm2, %v252_v46  ;;  %1108 = vmatpush.msra.mxu3 %v841_v33 }
  0xdb   :  { %926 = vmatpush.msra.mxu0 %v841_v33 }
  0xdc   :  { %1109 = vmatpush.msrb.mxu3 %v1475_v19 }
  0xde   :  { %637 = vrot.lane.b32.xlu0 %v1447_v9, %s1126_s21  ;;  %443 = vrot.lane.b32.xlu2 %v1277_v30, %s1125_s20 }
  0xdf   :  { %540 = vrot.lane.b32.xlu1 %v1308_v39, %s1123_s16  ;;  %1110 = vmatpush.msrb.mxu3 %v1480_v25 }
  0xe0   :  { %v533_v21 = vpop.permute.xlu0 %532  ;;  %v438_v24 = vpop.permute.xlu2 %437 }
  0xe1   :  { %v339_v48 = vpop.permute.xlu1 %338 }
  0xe2   :  { %380 = vst.msk [vmem:[#allocation3 + $0x70] sm:$0xff] %vm372_vm3, %v339_v48 }
  0xe3   :  { %477 = vst.msk [vmem:[#allocation3 + $0x70] sm:$0xff] %vm469_vm4, %v436_v31  ;;  %v395_v31 = vld [vmem:[#allocation2 + $0x39] sm:$0xff] }
  0xe4   :  { %574 = vst.msk [vmem:[#allocation3 + $0x70] sm:$0xff] %vm566_vm5, %v533_v21 }
  0xe6   :  { %427 = vrot.lane.b32.xlu0 %v1244_v22, %s1125_s20  ;;  %716 = vrot.lane.b32.xlu2 %v1244_v22, %s1127_s22 }
  0xe7   :  { %734 = vrot.lane.b32.xlu1 %v1298_v37, %s1127_s22 }
  0xe8   :  { %v341_v30 = vpop.permute.xlu0 %340  ;;  %v452_v39 = vpop.permute.xlu2 %451 }
  0xe9   :  { %v630_v19 = vpop.permute.xlu1 %629  ;;  %381 = vst.msk [vmem:[#allocation3 + $0x80] sm:$0xff] %vm372_vm3, %v341_v30 }
  0xea   :  { %671 = vst.msk [vmem:[#allocation3 + $0x70] sm:$0xff] %vm663_vm6, %v630_v19 }
  0xeb   :  { %768 = vst.msk [vmem:[#allocation3 + $0x70] sm:$0xff] %vm760_vm7, %v727_v43 }
  0xec   :  { %478 = vst.msk [vmem:[#allocation3 + $0x80] sm:$0xff] %vm469_vm4, %v438_v24 }
  0xee   :  { %445 = vrot.lane.b32.xlu0 %v1298_v37, %s1125_s20  ;;  %330 = vrot.lane.b32.xlu2 %v1382_v54, %s1124_s19 }
  0xef   :  { %348 = vrot.lane.b32.xlu1 %v1447_v9, %s1124_s19 }
  0xf0   :  { %v355_v22 = vpop.permute.xlu0 %354  ;;  %v729_v25 = vpop.permute.xlu2 %728 }
  0xf1   :  { %v258_v51 = vpop.permute.xlu1 %257 }
  0xf2   :  { %291 = vst.msk [vmem:[#allocation3 + $0xf0] sm:$0xff] %vm275_vm2, %v258_v51  ;;  %v823_v52 = vld [vmem:[#allocation3 + $0x70] sm:$0xff] }
  0xf3   :  { %948 = vmatmul.f32.vlgmr.msra.gmra.mxu2 %v823_v52  ;;  %388 = vst.msk [vmem:[#allocation3 + $0xf0] sm:$0xff] %vm372_vm3, %v355_v22 }
  0xf4   :  { %485 = vst.msk [vmem:[#allocation3 + $0xf0] sm:$0xff] %vm469_vm4, %v452_v39 }
  0xf6   :  { %718 = vrot.lane.b32.xlu0 %v1262_v26, %s1127_s22  ;;  %524 = vrot.lane.b32.xlu2 %v1306_v38, %s1123_s16 }
  0xf7   :  { %621 = vrot.lane.b32.xlu1 %v1395_v57, %s1126_s21 }
  0xf8   :  { %v632_v37 = vpop.permute.xlu0 %631  ;;  %v743_v54 = vpop.permute.xlu2 %742 }
  0xf9   :  { %v535_v9 = vpop.permute.xlu1 %534 }
  0xfa   :  { %575 = vst.msk [vmem:[#allocation3 + $0x80] sm:$0xff] %vm566_vm5, %v535_v9 }
  0xfb   :  { %672 = vst.msk [vmem:[#allocation3 + $0x80] sm:$0xff] %vm663_vm6, %v632_v37 }
  0xfc   :  { %769 = vst.msk [vmem:[#allocation3 + $0x80] sm:$0xff] %vm760_vm7, %v729_v25 }
  0xfe   :  { %332 = vrot.lane.b32.xlu0 %v1395_v57, %s1124_s19  ;;  %542 = vrot.lane.b32.xlu2 %v1352_v49, %s1123_s16 }
  0xff   :  { %639 = vrot.lane.b32.xlu1 %v1442_v5, %s1126_s21 }
 0x100   :  { %v646_v38 = vpop.permute.xlu0 %645  ;;  %v519_v23 = vpop.permute.xlu2 %518 }
 0x101   :  { %v549_v16 = vpop.permute.xlu1 %548 }
 0x102   :  { %582 = vst.msk [vmem:[#allocation3 + $0xf0] sm:$0xff] %vm566_vm5, %v549_v16 }
 0x103   :  { %679 = vst.msk [vmem:[#allocation3 + $0xf0] sm:$0xff] %vm663_vm6, %v646_v38  ;;  %v825_v55 = vld [vmem:[#allocation3 + $0x80] sm:$0xff] }
 0x104   :  { %776 = vst.msk [vmem:[#allocation3 + $0xf0] sm:$0xff] %vm760_vm7, %v743_v54  ;;  %951 = vmatmul.f32.gmra.mxu2 %v825_v55 }
 0x106   :  { %526 = vrot.lane.b32.xlu0 %v1269_v28, %s1123_s16  ;;  %736 = vrot.lane.b32.xlu2 %v1318_v41, %s1127_s22 }
 0x107   :  { %429 = vrot.lane.b32.xlu1 %v1262_v26, %s1125_s20 }
 0x108   :  { %v422_v49 = vpop.permute.xlu0 %421  ;;  %v537_v57 = vpop.permute.xlu2 %536 }
 0x109   :  { %v325_v56 = vpop.permute.xlu1 %324 }
 0x10a   :  { %373 = vst.msk [vmem:[#allocation3] sm:$0xff] %vm372_vm3, %v325_v56 }
 0x10b   :  { %470 = vst.msk [vmem:[#allocation3] sm:$0xff] %vm469_vm4, %v422_v49  ;;  %v839_v60 = vld [vmem:[#allocation3 + $0xf0] sm:$0xff] }
 0x10c   :  { %567 = vst.msk [vmem:[#allocation3] sm:$0xff] %vm566_vm5, %v519_v23  ;;  %972 = vmatmul.f32.vlgmr.msra.gmra.mxu3 %v839_v60 }
 0x10e   :  { %544 = vrot.lane.b32.xlu0 %v1328_v45, %s1123_s16  ;;  %350 = vrot.lane.b32.xlu2 %v1442_v5, %s1124_s19 }
 0x10f   :  { %447 = vrot.lane.b32.xlu1 %v1318_v41, %s1125_s20 }
 0x110   :  { %v440_v26 = vpop.permute.xlu0 %439  ;;  %v731_v28 = vpop.permute.xlu2 %730 }
 0x111   :  { %v343_v63 = vpop.permute.xlu1 %342 }
 0x112   :  { %382 = vst.msk [vmem:[#allocation3 + $0x90] sm:$0xff] %vm372_vm3, %v343_v63 }
 0x113   :  { %479 = vst.msk [vmem:[#allocation3 + $0x90] sm:$0xff] %vm469_vm4, %v440_v26 }
 0x114   :  { %576 = vst.msk [vmem:[#allocation3 + $0x90] sm:$0xff] %vm566_vm5, %v537_v57  ;;  %1071 = vmatmul.msk.f32.vlgmr.msrb.gmra.mxu3 %vm14_vm0, %v830_v1 }
 0x116   :  { %738 = vrot.lane.b32.xlu0 %v1294_v35, %s1127_s22  ;;  %623 = vrot.lane.b32.xlu2 %v1409_v61, %s1126_s21 }
 0x117   :  { %720 = vrot.lane.b32.xlu1 %v1239_v20, %s1127_s22 }
 0x118   :  { %v713_v41 = vpop.permute.xlu0 %712  ;;  %v345_v45 = vpop.permute.xlu2 %344 }
 0x119   :  { %v616_v5 = vpop.permute.xlu1 %615  ;;  %383 = vst.msk [vmem:[#allocation3 + $0xa0] sm:$0xff] %vm372_vm3, %v345_v45 }
 0x11a   :  { %664 = vst.msk [vmem:[#allocation3] sm:$0xff] %vm663_vm6, %v616_v5 }
 0x11b   :  { %761 = vst.msk [vmem:[#allocation3] sm:$0xff] %vm760_vm7, %v713_v41 }
 0x11c   :  { %1072 = vmatmul.msk.f32.gmra.mxu3 %vm14_vm0, %v832_v40 }
 0x11e   :  { %352 = vrot.lane.b32.xlu0 %v1457_v10, %s1124_s19  ;;  %641 = vrot.lane.b32.xlu2 %v1457_v10, %s1126_s21 }
 0x11f   :  { %334 = vrot.lane.b32.xlu1 %v1409_v61, %s1124_s19 }
 0x120   :  { %v327_v20 = vpop.permute.xlu0 %326  ;;  %v618_v0 = vpop.permute.xlu2 %617 }
 0x121   :  { %v634_v6 = vpop.permute.xlu1 %633  ;;  %374 = vst.msk [vmem:[#allocation3 + $0x10] sm:$0xff] %vm372_vm3, %v327_v20 }
 0x122   :  { %673 = vst.msk [vmem:[#allocation3 + $0x90] sm:$0xff] %vm663_vm6, %v634_v6  ;;  %v809_v8 = vld [vmem:[#allocation3] sm:$0xff] }
 0x123   :  { %770 = vst.msk [vmem:[#allocation3 + $0x90] sm:$0xff] %vm760_vm7, %v731_v28  ;;  %927 = vmatmul.f32.vlgmr.msra.gmra.mxu0 %v809_v8  ;;  %v1763_v28 = vld [vmem:[%s1861_s2] ss:$0 sm:$0xff] }
 0x124   :  { %1073 = vmatmul.msk.f32.gmra.mxu3 %vm14_vm0, %v834_v7 }
 0x126   :  { %625 = vrot.lane.b32.xlu0 %v1414_v62, %s1126_s21  ;;  %431 = vrot.lane.b32.xlu2 %v394_v11, %s1125_s20 }
 0x127   :  { %528 = vrot.lane.b32.xlu1 %v1271_v29, %s1123_s16  ;;  %v1707_v29 = vpop.f32.mrf.mxu1 }
 0x128   :  { %v521_v61 = vpop.permute.xlu0 %520  ;;  %v636_v10 = vpop.permute.xlu2 %635 }
 0x129   :  { %v424_v12 = vpop.permute.xlu1 %423 }
 0x12a   :  { %471 = vst.msk [vmem:[#allocation3 + $0x10] sm:$0xff] %vm469_vm4, %v424_v12  ;;  %v827_v14 = vld [vmem:[#allocation3 + $0x90] sm:$0xff] }
 0x12b   :  { %954 = vmatmul.f32.gmra.mxu2 %v827_v14  ;;  %568 = vst.msk [vmem:[#allocation3 + $0x10] sm:$0xff] %vm566_vm5, %v521_v61 }
 0x12c   :  { %665 = vst.msk [vmem:[#allocation3 + $0x10] sm:$0xff] %vm663_vm6, %v618_v0  ;;  %1074 = vmatmul.msk.f32.gmra.mxu3 %vm14_vm0, %v836_v13 }
 0x12e   :  { %643 = vrot.lane.b32.xlu0 %v1403_v59, %s1126_s21  ;;  %449 = vrot.lane.b32.xlu2 %v1294_v35, %s1125_s20 }
 0x12f   :  { %546 = vrot.lane.b32.xlu1 %v1354_v50, %s1123_s16  ;;  %v1718_v4 = vpop.f32.mrf.mxu1 }
 0x130   :  { %v539_v15 = vpop.permute.xlu0 %538  ;;  %v426_v17 = vpop.permute.xlu2 %425 }
 0x131   :  { %v442_v18 = vpop.permute.xlu1 %441 }
 0x132   :  { %480 = vst.msk [vmem:[#allocation3 + $0xa0] sm:$0xff] %vm469_vm4, %v442_v18 }
 0x133   :  { %577 = vst.msk [vmem:[#allocation3 + $0xa0] sm:$0xff] %vm566_vm5, %v539_v15 }
 0x134   :  { %674 = vst.msk [vmem:[#allocation3 + $0xa0] sm:$0xff] %vm663_vm6, %v636_v10  ;;  %1075 = vmatmul.msk.f32.gmra.mxu3 %vm14_vm0, %v838_v27 }
 0x136   :  { %433 = vrot.lane.b32.xlu0 %v395_v31, %s1125_s20  ;;  %722 = vrot.lane.b32.xlu2 %v395_v31, %s1127_s22 }
 0x137   :  { %740 = vrot.lane.b32.xlu1 %v1432_v3, %s1127_s22  ;;  %v1730_v46 = vpop.f32.mrf.mxu1 }
 0x138   :  { %v733_v35 = vpop.permute.xlu0 %732  ;;  %v444_v50 = vpop.permute.xlu2 %443 }
 0x139   :  { %v715_v59 = vpop.permute.xlu1 %714  ;;  %771 = vst.msk [vmem:[#allocation3 + $0xa0] sm:$0xff] %vm760_vm7, %v733_v35 }
 0x13a   :  { %762 = vst.msk [vmem:[#allocation3 + $0x10] sm:$0xff] %vm760_vm7, %v715_v59 }
 0x13c   :  { %1076 = vmatmul.msk.f32.gmra.mxu3 %vm14_vm0, %v840_v32 }
 0x13e   :  { %724 = vrot.lane.b32.xlu0 %v686_v58, %s1127_s22  ;;  %336 = vrot.lane.b32.xlu2 %v1414_v62, %s1124_s19 }
 0x13f   :  { %530 = vrot.lane.b32.xlu1 %v1325_v44, %s1123_s16  ;;  %v1738_v24 = vpop.f32.mrf.mxu1 }
 0x140   :  { %v347_v3 = vpop.permute.xlu0 %346  ;;  %v829_v33 = vld [vmem:[#allocation3 + $0xa0] sm:$0xff]  ;;  %v717_v34 = vpop.permute.xlu2 %716 }
 0x141   :  { %v329_v42 = vpop.permute.xlu1 %328  ;;  %v811_v43 = vld [vmem:[#allocation3 + $0x10] sm:$0xff]  ;;  %384 = vst.msk [vmem:[#allocation3 + $0xb0] sm:$0xff] %vm372_vm3, %v347_v3  ;;  %957 = vmatmul.f32.gmra.mxu2 %v829_v33 }
 0x142   :  { %375 = vst.msk [vmem:[#allocation3 + $0x20] sm:$0xff] %vm372_vm3, %v329_v42  ;;  %930 = vmatmul.f32.gmra.mxu0 %v811_v43 }
 0x143   :  { %472 = vst.msk [vmem:[#allocation3 + $0x20] sm:$0xff] %vm469_vm4, %v426_v17 }
 0x144   :  { %481 = vst.msk [vmem:[#allocation3 + $0xb0] sm:$0xff] %vm469_vm4, %v444_v50 }
 0x146   :  { %627 = vrot.lane.b32.xlu2 %v589_v47, %s1126_s21 }
 0x147   :  { %v1742_v22 = vpop.f32.mrf.mxu1 }
 0x148   :  { %v620_v44 = vpop.permute.xlu0 %619  ;;  %v331_v62 = vpop.permute.xlu2 %330 }
 0x149   :  { %v523_v21 = vpop.permute.xlu1 %522  ;;  %376 = vst.msk [vmem:[#allocation3 + $0x30] sm:$0xff] %vm372_vm3, %v331_v62 }
 0x14a   :  { %569 = vst.msk [vmem:[#allocation3 + $0x20] sm:$0xff] %vm566_vm5, %v523_v21 }
 0x14b   :  { %666 = vst.msk [vmem:[#allocation3 + $0x20] sm:$0xff] %vm663_vm6, %v620_v44 }
 0x14c   :  { %763 = vst.msk [vmem:[#allocation3 + $0x20] sm:$0xff] %vm760_vm7, %v717_v34 }
 0x14f   :  { %v1748_v38 = vpop.f32.mrf.mxu1 }
 0x150   :  { %v638_v48 = vpop.permute.xlu0 %637  ;;  %v525_v30 = vpop.permute.xlu2 %524 }
 0x151   :  { %v541_v39 = vpop.permute.xlu1 %540 }
 0x152   :  { %578 = vst.msk [vmem:[#allocation3 + $0xb0] sm:$0xff] %vm566_vm5, %v541_v39 }
 0x153   :  { %675 = vst.msk [vmem:[#allocation3 + $0xb0] sm:$0xff] %vm663_vm6, %v638_v48  ;;  %v813_v19 = vld [vmem:[#allocation3 + $0x20] sm:$0xff] }
 0x154   :  { %933 = vmatmul.f32.gmra.mxu0 %v813_v19 }
 0x157   :  { %v1755_v49 = vpop.f32.mrf.mxu1 }
 0x158   :  { %v428_v25 = vpop.permute.xlu0 %427  ;;  %v543_v51 = vpop.permute.xlu2 %542 }
 0x159   :  { %v735_v52 = vpop.permute.xlu1 %734  ;;  %473 = vst.msk [vmem:[#allocation3 + $0x30] sm:$0xff] %vm469_vm4, %v428_v25 }
 0x15a   :  { %772 = vst.msk [vmem:[#allocation3 + $0xb0] sm:$0xff] %vm760_vm7, %v735_v52 }
 0x15b   :  { %570 = vst.msk [vmem:[#allocation3 + $0x30] sm:$0xff] %vm566_vm5, %v525_v30 }
 0x15f   :  { %v1014_v1 = vpop.f32.mrf.mxu1 }
 0x160   :  { %v446_v53 = vpop.permute.xlu0 %445  ;;  %v737_v37 = vpop.permute.xlu2 %736 }
 0x161   :  { %v349_v54 = vpop.permute.xlu1 %348  ;;  %v831_v9 = vld [vmem:[#allocation3 + $0xb0] sm:$0xff] }
 0x162   :  { %385 = vst.msk [vmem:[#allocation3 + $0xc0] sm:$0xff] %vm372_vm3, %v349_v54  ;;  %960 = vmatmul.f32.gmra.mxu2 %v831_v9 }
 0x163   :  { %482 = vst.msk [vmem:[#allocation3 + $0xc0] sm:$0xff] %vm469_vm4, %v446_v53 }
 0x164   :  { %579 = vst.msk [vmem:[#allocation3 + $0xc0] sm:$0xff] %vm566_vm5, %v543_v51 }
 0x167   :  { %v1017_v8 = vpop.f32.mrf.mxu1 }
 0x168   :  { %v719_v23 = vpop.permute.xlu0 %718  ;;  %v351_v16 = vpop.permute.xlu2 %350 }
 0x169   :  { %v622_v55 = vpop.permute.xlu1 %621  ;;  %386 = vst.msk [vmem:[#allocation3 + $0xd0] sm:$0xff] %vm372_vm3, %v351_v16 }
 0x16a   :  { %667 = vst.msk [vmem:[#allocation3 + $0x30] sm:$0xff] %vm663_vm6, %v622_v55 }
 0x16b   :  { %764 = vst.msk [vmem:[#allocation3 + $0x30] sm:$0xff] %vm760_vm7, %v719_v23 }
 0x16f   :  { %v1020_v30 = vpop.f32.mrf.mxu1 }
 0x170   :  { %v333_v57 = vpop.permute.xlu0 %332  ;;  %v624_v56 = vpop.permute.xlu2 %623 }
 0x171   :  { %v640_v60 = vpop.permute.xlu1 %639  ;;  %377 = vst.msk [vmem:[#allocation3 + $0x40] sm:$0xff] %vm372_vm3, %v333_v57 }
 0x172   :  { %676 = vst.msk [vmem:[#allocation3 + $0xc0] sm:$0xff] %vm663_vm6, %v640_v60  ;;  %v815_v26 = vld [vmem:[#allocation3 + $0x30] sm:$0xff] }
 0x173   :  { %773 = vst.msk [vmem:[#allocation3 + $0xc0] sm:$0xff] %vm760_vm7, %v737_v37  ;;  %936 = vmatmul.f32.gmra.mxu0 %v815_v26 }
 0x176   :  { %v949_v63 = vpop.f32.mrf.mxu2 }
 0x177   :  { %v950_v2 = vadd.f32 %v1763_v28, %v949_v63 }
 0x178   :  { %v527_v41 = vpop.permute.xlu0 %526  ;;  %v642_v45 = vpop.permute.xlu2 %641 }
 0x179   :  { %v430_v5 = vpop.permute.xlu1 %429  ;;  %v1015_v40 = vadd.f32 %v1014_v1, %v950_v2 }
 0x17a   :  { %474 = vst.msk [vmem:[#allocation3 + $0x40] sm:$0xff] %vm469_vm4, %v430_v5  ;;  %v833_v36 = vld [vmem:[#allocation3 + $0xc0] sm:$0xff] }
 0x17b   :  { %1048 = vst [vmem:[%s1862_s3 + $0x38] sm:$0xff] %v1015_v40  ;;  %963 = vmatmul.f32.gmra.mxu2 %v833_v36 }
 0x17c   :  { %571 = vst.msk [vmem:[#allocation3 + $0x40] sm:$0xff] %vm566_vm5, %v527_v41 }
 0x17d   :  { %668 = vst.msk [vmem:[#allocation3 + $0x40] sm:$0xff] %vm663_vm6, %v624_v56 }
 0x180   :  { %v545_v20 = vpop.permute.xlu0 %544  ;;  %v432_v0 = vpop.permute.xlu2 %431 }
 0x181   :  { %v448_v6 = vpop.permute.xlu1 %447 }
 0x182   :  { %483 = vst.msk [vmem:[#allocation3 + $0xd0] sm:$0xff] %vm469_vm4, %v448_v6 }
 0x183   :  { %580 = vst.msk [vmem:[#allocation3 + $0xd0] sm:$0xff] %vm566_vm5, %v545_v20 }
 0x184   :  { %677 = vst.msk [vmem:[#allocation3 + $0xd0] sm:$0xff] %vm663_vm6, %v642_v45 }
 0x187   :  { %v952_v7 = vpop.f32.mrf.mxu2 }
 0x188   :  { %v739_v11 = vpop.permute.xlu0 %738  ;;  %v953_v61 = vadd.f32 %v1763_v28, %v952_v7  ;;  %v450_v10 = vpop.permute.xlu2 %449 }
 0x189   :  { %v721_v12 = vpop.permute.xlu1 %720  ;;  %774 = vst.msk [vmem:[#allocation3 + $0xd0] sm:$0xff] %vm760_vm7, %v739_v11 }
 0x18a   :  { %765 = vst.msk [vmem:[#allocation3 + $0x40] sm:$0xff] %vm760_vm7, %v721_v12  ;;  %v1018_v13 = vadd.f32 %v1017_v8, %v953_v61 }
 0x18c   :  { %1049 = vst [vmem:[%s1862_s3 + $0x40] sm:$0xff] %v1018_v13 }
 0x18f   :  { %v973_v14 = vpop.f32.mrf.mxu3 }
 0x190   :  { %v353_v15 = vpop.permute.xlu0 %352  ;;  %v835_v17 = vld [vmem:[#allocation3 + $0xd0] sm:$0xff]  ;;  %v723_v18 = vpop.permute.xlu2 %722  ;;  %v974_v9 = vadd.f32 %v1763_v28, %v973_v14 }
 0x191   :  { %v335_v27 = vpop.permute.xlu1 %334  ;;  %v817_v31 = vld [vmem:[#allocation3 + $0x40] sm:$0xff]  ;;  %387 = vst.msk [vmem:[#allocation3 + $0xe0] sm:$0xff] %vm372_vm3, %v353_v15  ;;  %966 = vmatmul.f32.gmra.mxu2 %v835_v17 }
 0x192   :  { %378 = vst.msk [vmem:[#allocation3 + $0x50] sm:$0xff] %vm372_vm3, %v335_v27  ;;  %939 = vmatmul.f32.gmra.mxu0 %v817_v31 }
 0x193   :  { %475 = vst.msk [vmem:[#allocation3 + $0x50] sm:$0xff] %vm469_vm4, %v432_v0 }
 0x194   :  { %484 = vst.msk [vmem:[#allocation3 + $0xe0] sm:$0xff] %vm469_vm4, %v450_v10 }
 0x197   :  { %v1023_v35 = vpop.f32.mrf.mxu3 }
 0x198   :  { %v626_v50 = vpop.permute.xlu0 %625  ;;  %v337_v59 = vpop.permute.xlu2 %336 }
 0x199   :  { %v529_v32 = vpop.permute.xlu1 %528  ;;  %379 = vst.msk [vmem:[#allocation3 + $0x60] sm:$0xff] %vm372_vm3, %v337_v59 }
 0x19a   :  { %572 = vst.msk [vmem:[#allocation3 + $0x50] sm:$0xff] %vm566_vm5, %v529_v32 }
 0x19b   :  { %669 = vst.msk [vmem:[#allocation3 + $0x50] sm:$0xff] %vm663_vm6, %v626_v50 }
 0x19c   :  { %766 = vst.msk [vmem:[#allocation3 + $0x50] sm:$0xff] %vm760_vm7, %v723_v18 }
 0x19f   :  { %v1026_v58 = vpop.f32.mrf.mxu3 }
 0x1a0   :  { %v928_v3 = vpop.f32.mrf.mxu0  ;;  %v644_v33 = vpop.permute.xlu0 %643 }
 0x1a1   :  { %v547_v34 = vpop.permute.xlu1 %546  ;;  %v929_v42 = vadd.f32 %v1763_v28, %v928_v3  ;;  %v628_v52 = vpop.permute.xlu2 %627 }
 0x1a2   :  { %581 = vst.msk [vmem:[#allocation3 + $0xe0] sm:$0xff] %vm566_vm5, %v547_v34 }
 0x1a3   :  { %v994_v43 = vadd.f32 %v1707_v29, %v929_v42  ;;  %678 = vst.msk [vmem:[#allocation3 + $0xe0] sm:$0xff] %vm663_vm6, %v644_v33  ;;  %v819_v47 = vld [vmem:[#allocation3 + $0x50] sm:$0xff] }
 0x1a4   :  { %942 = vmatmul.f32.gmra.mxu0 %v819_v47 }
 0x1a5   :  { %1041 = vst [vmem:[%s1862_s3] sm:$0xff] %v994_v43 }
 0x1a7   :  { %v1029_v44 = vpop.f32.mrf.mxu3 }
 0x1a8   :  { %v434_v62 = vpop.permute.xlu0 %433 }
 0x1a9   :  { %v741_v21 = vpop.permute.xlu1 %740  ;;  %476 = vst.msk [vmem:[#allocation3 + $0x60] sm:$0xff] %vm469_vm4, %v434_v62 }
 0x1aa   :  { %775 = vst.msk [vmem:[#allocation3 + $0xe0] sm:$0xff] %vm760_vm7, %v741_v21 }
 0x1ae   :  { %v955_v48 = vpop.f32.mrf.mxu2 }
 0x1af   :  { %v956_v39 = vadd.f32 %v1763_v28, %v955_v48  ;;  %v1032_v29 = vpop.f32.mrf.mxu3 }
 0x1b0   :  { %v725_v53 = vpop.permute.xlu0 %724 }
 0x1b1   :  { %v837_v19 = vld [vmem:[#allocation3 + $0xe0] sm:$0xff]  ;;  %v1021_v25 = vadd.f32 %v1020_v30, %v956_v39  ;;  %v531_v51 = vpop.permute.xlu1 %530 }
 0x1b2   :  { %969 = vmatmul.f32.gmra.mxu2 %v837_v19  ;;  %573 = vst.msk [vmem:[#allocation3 + $0x60] sm:$0xff] %vm566_vm5, %v531_v51 }
 0x1b3   :  { %1050 = vst [vmem:[%s1862_s3 + $0x48] sm:$0xff] %v1021_v25 }
 0x1b4   :  { %670 = vst.msk [vmem:[#allocation3 + $0x60] sm:$0xff] %vm663_vm6, %v628_v52 }
 0x1b5   :  { %767 = vst.msk [vmem:[#allocation3 + $0x60] sm:$0xff] %vm760_vm7, %v725_v53 }
 0x1b7   :  { %v1035_v37 = vpop.f32.mrf.mxu3 }
 0x1bc   :  { %v821_v54 = vld [vmem:[#allocation3 + $0x60] sm:$0xff] }
 0x1bd   :  { %945 = vmatmul.f32.gmra.mxu0 %v821_v54 }
 0x1bf   :  { %v931_v23 = vpop.f32.mrf.mxu0  ;;  %v1038_v16 = vpop.f32.mrf.mxu3 }
 0x1c0   :  { %v932_v55 = vadd.f32 %v1763_v28, %v931_v23  ;;  %v1039_v57 = vadd.f32 %v1038_v16, %v974_v9 }
 0x1c2   :  { %v997_v56 = vadd.f32 %v1718_v4, %v932_v55  ;;  %1056 = vst [vmem:[%s1862_s3 + $0x78] sm:$0xff] %v1039_v57 }
 0x1c4   :  { %1042 = vst [vmem:[%s1862_s3 + $0x8] sm:$0xff] %v997_v56  ;;  %v958_v60 = vpop.f32.mrf.mxu2 }
 0x1c5   :  { %v959_v26 = vadd.f32 %v1763_v28, %v958_v60 }
 0x1c7   :  { %v1024_v63 = vadd.f32 %v1023_v35, %v959_v26 }
 0x1c9   :  { %1051 = vst [vmem:[%s1862_s3 + $0x50] sm:$0xff] %v1024_v63 }
 0x1d1   :  { %v934_v1 = vpop.f32.mrf.mxu0 }
 0x1d2   :  { %v935_v2 = vadd.f32 %v1763_v28, %v934_v1 }
 0x1d4   :  { %v1000_v4 = vadd.f32 %v1730_v46, %v935_v2 }
 0x1d6   :  { %1043 = vst [vmem:[%s1862_s3 + $0x10] sm:$0xff] %v1000_v4 }
 0x1e5   :  { %v961_v41 = vpop.f32.mrf.mxu2 }
 0x1e6   :  { %v962_v45 = vadd.f32 %v1763_v28, %v961_v41 }
 0x1e8   :  { %v1027_v5 = vadd.f32 %v1026_v58, %v962_v45 }
 0x1ea   :  { %1052 = vst [vmem:[%s1862_s3 + $0x58] sm:$0xff] %v1027_v5 }
 0x1f0   :  { %v937_v40 = vpop.f32.mrf.mxu0 }
 0x1f1   :  { %v938_v36 = vadd.f32 %v1763_v28, %v937_v40 }
 0x1f3   :  { %v1003_v20 = vadd.f32 %v1738_v24, %v938_v36 }
 0x1f5   :  { %1044 = vst [vmem:[%s1862_s3 + $0x18] sm:$0xff] %v1003_v20 }
 0x1fe   :  { %v964_v46 = vpop.f32.mrf.mxu2 }
 0x1ff   :  { %v965_v0 = vadd.f32 %v1763_v28, %v964_v46 }
 0x201   :  { %v1030_v6 = vadd.f32 %v1029_v44, %v965_v0 }
 0x203   :  { %1053 = vst [vmem:[%s1862_s3 + $0x60] sm:$0xff] %v1030_v6 }
 0x20f   :  { %v940_v7 = vpop.f32.mrf.mxu0 }
 0x210   :  { %v941_v8 = vadd.f32 %v1763_v28, %v940_v7 }
 0x212   :  { %v1006_v11 = vadd.f32 %v1742_v22, %v941_v8 }
 0x214   :  { %1045 = vst [vmem:[%s1862_s3 + $0x20] sm:$0xff] %v1006_v11  ;;  %v967_v24 = vpop.f32.mrf.mxu2 }
 0x215   :  { %v968_v61 = vadd.f32 %v1763_v28, %v967_v24 }
 0x217   :  { %v1033_v10 = vadd.f32 %v1032_v29, %v968_v61 }
 0x219   :  { %1054 = vst [vmem:[%s1862_s3 + $0x68] sm:$0xff] %v1033_v10 }
 0x221   :  { %v943_v12 = vpop.f32.mrf.mxu0 }
 0x222   :  { %v944_v13 = vadd.f32 %v1763_v28, %v943_v12 }
 0x224   :  { %v1009_v14 = vadd.f32 %v1748_v38, %v944_v13 }
 0x226   :  { %1046 = vst [vmem:[%s1862_s3 + $0x28] sm:$0xff] %v1009_v14 }
 0x235   :  { %v970_v22 = vpop.f32.mrf.mxu2 }
 0x236   :  { %v971_v15 = vadd.f32 %v1763_v28, %v970_v22 }
 0x238   :  { %v1036_v17 = vadd.f32 %v1035_v37, %v971_v15 }
 0x23a   :  { %1055 = vst [vmem:[%s1862_s3 + $0x70] sm:$0xff] %v1036_v17  ;;  %v946_v18 = vpop.f32.mrf.mxu0 }
 0x23b   :  { %v947_v27 = vadd.f32 %v1763_v28, %v946_v18 }
 0x23d   :  { %v1012_v31 = vadd.f32 %v1755_v49, %v947_v27 }
 0x23f   :  { %1047 = vst [vmem:[%s1862_s3 + $0x30] sm:$0xff] %v1012_v31 }

</bundles_post_ra>
